<compile_context>
chip_gen: v7x
topology: tpu7x:2x2x1
jax: 0.10.0
libtpu: 0.0.40
codegen_flags: <defaults>
</compile_context>

<pallas_src>
import jax
import jax.numpy as jnp
from jax import lax
from jax.experimental import pallas as pl
from jax.experimental.pallas import tpu as pltpu


_ROW_STRIP = 32  # rows per in-kernel strip; bounds f32 intermediates per dot


def _nconv_kernel(a_ref, x_ref, o_ref):
    """One grid step over a block of (n, c) rows.

    a_ref: (V, W)     adjacency, resident across the whole grid
    x_ref: (kb, V*L)  kb (n, c) slices, lane-dense and contiguous in HBM
    o_ref: (kb, W*L)  same layout on the output side
    """
    v, w = a_ref.shape
    kb, vl = x_ref.shape
    l = vl // v
    a = a_ref[...]  # hoisted: loaded once per grid step

    # Strip-mine over rows so the f32 intermediates of each dot stay small
    # (avoids vreg-spill traffic when kb is large).  All slice starts/sizes
    # are static; for small kb this is a single iteration.
    for s0 in range(0, kb, _ROW_STRIP):
        sb = min(_ROW_STRIP, kb - s0)
        xs = x_ref[pl.ds(s0, sb), :]                                 # (sb, V*L)
        # (sb, V*L) -> (sb, V, L) -> (sb, L, V) -> (sb*L, V): put the
        # contraction dim minor for a plain 2-D MXU matmul.  These are
        # in-VMEM relayouts; the kernel is DMA-bound so they are free filler.
        xt = jnp.swapaxes(xs.reshape(sb, v, l), 1, 2).reshape(sb * l, v)
        acc = lax.dot_general(
            xt, a,
            dimension_numbers=(((1,), (0,)), ((), ())),
            preferred_element_type=jnp.float32,
        )                                                            # (sb*L, W)
        # (sb*L, W) -> (sb, W, L) -> collapsed back to the output row layout.
        res = jnp.swapaxes(acc.reshape(sb, l, w), 1, 2).reshape(sb, w * l)
        o_ref[pl.ds(s0, sb), :] = res.astype(o_ref.dtype)


def _tpu_budget():
    """(vmem_limit_bytes, per_step_byte_target), chosen per TPU generation."""
    vmem_cap = None
    try:
        vmem_cap = getattr(pltpu.get_tpu_info(), "vmem_capacity_bytes", None)
    except Exception:  # query unavailable -> stay conservative
        vmem_cap = None
    if vmem_cap is not None and vmem_cap > 96 * 1024 * 1024:
        # v5e / v6e class (128 MiB physical VMEM): raise the scoped limit well
        # past the 16/32 MiB defaults; generous per-step transfers.
        return 64 * 1024 * 1024, 6 * 1024 * 1024
    # v7x class (64 MiB VMEM, ~2.3x HBM BW) or unknown: keep the scoped limit
    # at 32 MiB but still target large per-step transfers so the fixed
    # ~0.35 us/step overhead stays small against the faster HBM.
    return 32 * 1024 * 1024, 8 * 1024 * 1024


def nconv(x, A, *, out_dtype=None, rows_per_step=None, buffer_count=None):
    """einsum('ncvl,vw->ncwl', x, A) as a Pallas TPU kernel.

    x: (N, C, V, L); A: (V, W).  Returns (N, C, W, L) in `out_dtype`
    (default: x.dtype).  Pass bf16 x/A (and out_dtype=bf16) from upstream for
    the memory-bound fast path; accumulation stays f32 either way.
    """
    N, C, V, L = x.shape
    Vw, W = A.shape
    assert V == Vw, "contraction dim mismatch between x and A"
    if A.dtype != x.dtype:
        A = A.astype(x.dtype)  # A is tiny; keep MXU operands uniform
    out_dtype = x.dtype if out_dtype is None else jnp.dtype(out_dtype)

    B = N * C
    x2 = x.reshape(B, V * L)  # free row-major view -- no copy

    # Sublane quantum for block legality (8 rows f32, 16 bf16, 32 int8/fp8).
    q = max(8, 32 // x.dtype.itemsize, 32 // out_dtype.itemsize)

    vmem_limit, step_target = _tpu_budget()
    bytes_per_row = V * L * x.dtype.itemsize + W * L * out_dtype.itemsize

    if rows_per_step is not None:
        kb = min(int(rows_per_step), B)
        assert kb == B or kb % q == 0, "rows_per_step must be a sublane multiple"
    elif B <= q:
        kb = B  # single full-extent block (always legal)
    else:
        kb = max(1, step_target // bytes_per_row)
        # Keep >= 2 (>= 4 for larger B) grid steps so the software pipeline has
        # work to overlap and v7x's two TensorCores both get blocks from the
        # "parallel" axis; floor to the sublane quantum for block legality.
        min_steps = 4 if B >= 4 * q else 2
        kb = min(kb, B // min_steps)
        kb = max(q, (kb // q) * q)
        kb = min(kb, B)
    grid = (pl.cdiv(B, kb),)
    # NOTE: a ragged last block reads OOB padding in x, but those rows only feed
    # masked-out output rows (no cross-row reduction), so results are exact.

    x_spec_kwargs = {}
    if buffer_count is not None:  # optional deeper pipelining if DMA is exposed
        x_spec_kwargs["pipeline_mode"] = pl.Buffered(int(buffer_count))

    cost = pl.CostEstimate(
        flops=2 * B * V * W * L,
        transcendentals=0,
        bytes_accessed=(B * V * L + V * W) * x.dtype.itemsize
        + B * W * L * out_dtype.itemsize,
    )

    out2 = pl.pallas_call(
        _nconv_kernel,
        out_shape=jax.ShapeDtypeStruct((B, W * L), out_dtype),
        grid_spec=pltpu.PrefetchScalarGridSpec(
            num_scalar_prefetch=0,
            grid=grid,
            in_specs=[
                pl.BlockSpec((V, W), lambda i: (0, 0)),                 # A resident
                pl.BlockSpec((kb, V * L), lambda i: (i, 0), **x_spec_kwargs),
            ],
            out_specs=pl.BlockSpec((kb, W * L), lambda i: (i, 0)),
        ),
        compiler_params=pltpu.CompilerParams(
            # Row blocks are independent -> "parallel" (megacore-shardable on
            # v7x; no-op on v5e/v6e).  pltpu.CORE_PARALLEL is worth a sweep.
            dimension_semantics=("parallel",),
            vmem_limit_bytes=vmem_limit,
        ),
        cost_estimate=cost,
    )(A, x2)

    return out2.reshape(N, C, W, L)  # free row-major view -- no copy


if __name__ == "__main__":
    keys = jax.random.split(jax.random.PRNGKey(0), 4)

    def reference(x, A):
        return jnp.einsum("ncvl,vw->ncwl",
                          x.astype(jnp.float32), A.astype(jnp.float32))

    # Case 1: small shapes consistent with the module
    # (N=2, C=4, V=16 graph nodes, L=8 time steps; adjacency A is (V, V)).
    N, C, V, L = 2, 4, 16, 8
    x = jax.random.normal(keys[0], (N, C, V, L), dtype=jnp.float32)
    A = jax.random.normal(keys[1], (V, V), dtype=jnp.float32)
    out = jax.block_until_ready(nconv(x, A))
    assert out.shape == (N, C, V, L)
    assert out.dtype == x.dtype
    assert jnp.allclose(out, reference(x, A), atol=2e-3, rtol=2e-3)

    # Case 2: more (n, c) rows -> multi-step grid with a ragged last block.
    N2, C2 = 2, 13  # B = 26 rows -> kb = 8 -> 4 grid steps (last block ragged)
    x2 = jax.random.normal(keys[2], (N2, C2, V, L), dtype=jnp.float32)
    A2 = jax.random.normal(keys[3], (V, V), dtype=jnp.float32)
    out2 = jax.block_until_ready(nconv(x2, A2))
    assert jnp.allclose(out2, reference(x2, A2), atol=2e-3, rtol=2e-3)

    # Case 3: bf16 activations/weights + bf16 output (memory-bound fast path);
    # accumulation stays f32 inside the kernel.
    xb = x2.astype(jnp.bfloat16)
    Ab = A2.astype(jnp.bfloat16)
    outb = jax.block_until_ready(nconv(xb, Ab, out_dtype=jnp.bfloat16))
    assert outb.dtype == jnp.bfloat16
    assert jnp.allclose(outb.astype(jnp.float32), reference(xb, Ab),
                        atol=0.5, rtol=0.1)

    print("KERNEL_OK")
</pallas_src>

<mosaic_0001>
module attributes {stable_mosaic.version = 11 : i64} {
  func.func @_nconv_kernel(%arg0: i32, %arg1: memref<16x16xf32, #tpu.memory_space<vmem>>, %arg2: memref<8x128xf32, #tpu.memory_space<vmem>>, %arg3: memref<8x128xf32, #tpu.memory_space<vmem>>) attributes {dimension_semantics = [#tpu.dimension_semantics<parallel>], iteration_bounds = array<i64: 1>, scalar_prefetch = 0 : i64, scratch_operands = 0 : i64, tpu.core_type = #tpu.core_type<tc>, window_params = [{pipeline_mode = #tpu.pipeline_mode<synchronous>, transform_indices = @transform_0, window_bounds = array<i64: 16, 16>}, {transform_indices = @transform_1, window_bounds = array<i64: 8, 128>}, {transform_indices = @transform_2, window_bounds = array<i64: 8, 128>}]} {
    %c0 = arith.constant 0 : index
    %c0_0 = arith.constant 0 : index
    %0 = vector.load %arg1[%c0, %c0_0] : memref<16x16xf32, #tpu.memory_space<vmem>>, vector<16x16xf32>
    %c0_1 = arith.constant 0 : index
    %c0_2 = arith.constant 0 : index
    %1 = vector.load %arg2[%c0_1, %c0_2] : memref<8x128xf32, #tpu.memory_space<vmem>>, vector<8x128xf32>
    %2 = vector.shape_cast %1 : vector<8x128xf32> to vector<8x16x8xf32>
    %3 = tpu.transpose %2, [0, 2, 1] : vector<8x16x8xf32> -> vector<8x8x16xf32>
    %4 = vector.shape_cast %3 : vector<8x8x16xf32> to vector<64x16xf32>
    %cst = arith.constant dense<0.000000e+00> : vector<64x16xf32>
    %5 = tpu.matmul %4, %0, %cst {dimension_numbers = #tpu.dot_dimension_numbers<[1], [0], [0], [1], [0, 0, 1, 1], [], []>} : vector<64x16xf32>, vector<16x16xf32>, vector<64x16xf32> -> vector<64x16xf32>
    %6 = vector.shape_cast %5 : vector<64x16xf32> to vector<8x8x16xf32>
    %7 = tpu.transpose %6, [0, 2, 1] : vector<8x8x16xf32> -> vector<8x16x8xf32>
    %8 = vector.shape_cast %7 : vector<8x16x8xf32> to vector<8x128xf32>
    %c0_3 = arith.constant 0 : index
    %c0_4 = arith.constant 0 : index
    %9 = vector.load %arg3[%c0_3, %c0_4] : memref<8x128xf32, #tpu.memory_space<vmem>>, vector<8x128xf32>
    tpu.vector_store %arg3[%c0_3, %c0_4], %8 {strides = array<i32>} : memref<8x128xf32, #tpu.memory_space<vmem>>, vector<8x128xf32>,
    return
  }
  func.func @transform_0(%arg0: i32) -> (i32, i32) {
    %c0_i32 = arith.constant 0 : i32
    %c0_i32_0 = arith.constant 0 : i32
    %c0_i32_1 = arith.constant 0 : i32
    return %c0_i32, %c0_i32_0 : i32, i32
  }
  func.func @transform_1(%arg0: i32) -> (i32, i32) {
    %c0_i32 = arith.constant 0 : i32
    %c0_i32_0 = arith.constant 0 : i32
    return %arg0, %c0_i32 : i32, i32
  }
  func.func @transform_2(%arg0: i32) -> (i32, i32) {
    %c0_i32 = arith.constant 0 : i32
    %c0_i32_0 = arith.constant 0 : i32
    return %arg0, %c0_i32 : i32, i32
  }
}

</mosaic_0001>

<bundles_post_ra>
// kernel: tpu_custom_call.1
= control target key start
LH: loop header
LB: loop body
LE: loop exit
PB: predicated region body
PF: predicated region fallthrough
CT: control target
= control target key end

     0   :  { %7 = vsyncpa [#allocation3], 0  ;;  %s1749_s0 = inlined_call_operand.hbm [shape: f32[16,16], index: 0, kind: input, shape index: {}]   ;;  %s1750_s1 = inlined_call_operand.hbm [shape: f32[8,128], index: 1, kind: input, shape index: {}]   ;;  %s1751_s2 = inlined_call_operand.hbm [shape: f32[8,128], index: 2, kind: output, shape index: {}]  }
   0x1   :  { %8 = vsyncpa [#allocation6], 0 }
   0x2   :  { %9 = vsyncpa [#allocation4], 0  ;;  %s1513_s9 = smov [#allocation2]   ;;  %s1441_s13 = scalar_lea.hbm %s1749_s0, 256 }
   0x3   :  { %s15_s10 = sshll.u32 %s1513_s9, 4  ;;  %p1442_p0 = scmp.ne.s32.totalorder %s1749_s0, %s1441_s13  ;;  %s16_s10 = int_to_ptr.vmem [resolvable:$true] %s15_s10 }
   0x4   :  { %p1445_p1 = scmp.lt.u32.totalorder %s1441_s13, %s1749_s0 }
   0x6   :  { %p1447_p2 = pnand %p1445_p1, %p1442_p0 }
   0x8   :  { %1450 = shalt.err (!%p1447_p2)
}
   0x9   :  { %s1451_s18 = scalar_lea.vmem %s16_s10, 256  ;;  %p1456_p4 = scmp.lt.s32.totalorder %s16_s10, %s16_s10 }
   0xa   :  { %p1452_p3 = scmp.ne.s32.totalorder %s16_s10, %s1451_s18  ;;  %p1457_p5 = scmp.lt.s32.totalorder %s1451_s18, %s1451_s18 }
   0xc   :  { %p1458_p6 = por %p1457_p5, %p1456_p4 }
   0xe   :  { %p1459_p7 = pnand %p1458_p6, %p1452_p3 }
  0x10   :  { %1462 = shalt.err (!%p1459_p7)
}
  0x11   :  { %s1514_s19 = smov 128   ;;  %s1515_s20 = smov 8  }
  0x12   :  { %21 = dma.hbm_to_vmem [thread:$0]  %s1749_s0, 256, %s16_s10, [#allocation3], %s1514_s19, %s1514_s19, %s1515_s20  }
  0x13   :  { %s1516_s23 = smov [#allocation5]   ;;  %s1463_s27 = scalar_lea.hbm %s1750_s1, 128 }
  0x14   :  { %s28_s24 = sshll.u32 %s1516_s23, 4  ;;  %p1464_p8 = scmp.ne.s32.totalorder %s1750_s1, %s1463_s27  ;;  %s29_s24 = int_to_ptr.vmem [resolvable:$true] %s28_s24 }
  0x15   :  { %p1467_p9 = scmp.lt.u32.totalorder %s1463_s27, %s1750_s1 }
  0x17   :  { %p1469_p10 = pnand %p1467_p9, %p1464_p8 }
  0x19   :  { %1472 = shalt.err (!%p1469_p10)
}
  0x1a   :  { %s1473_s4 = scalar_lea.vmem %s29_s24, 128  ;;  %p1478_p12 = scmp.lt.s32.totalorder %s29_s24, %s29_s24 }
  0x1b   :  { %p1474_p11 = scmp.ne.s32.totalorder %s29_s24, %s1473_s4  ;;  %p1479_p13 = scmp.lt.s32.totalorder %s1473_s4, %s1473_s4 }
  0x1d   :  { %p1480_p0 = por %p1479_p13, %p1478_p12 }
  0x1f   :  { %p1481_p1 = pnand %p1480_p0, %p1474_p11 }
  0x21   :  { %1484 = shalt.err (!%p1481_p1)
}
  0x22   :  { %31 = dma.hbm_to_vmem [thread:$0]  %s1750_s1, 128, %s29_s24, [#allocation6]  }
  0x23   :  { %1507 = dma.done.wait [#allocation3], 256  }
  0x24   :  { %1508 = vsyncadd [#allocation3], 4294967040 }
  0x25   :  { %1509 = dma.done.wait [#allocation6], 128  }
  0x26   :  { %1510 = vsyncadd [#allocation6], 4294967168  ;;  %v40_v0 = vld [vmem:[#allocation5] sm:$0xff]  ;;  %s1517_s6 = smov 104   ;;  %s1518_s7 = smov 120   ;;  %v92_v4 = vlaneseq  ;;  %vm615_vm0 = vcmask 130048  }
  0x27   :  { %48 = vrot.lane.b32.xlu1 %v40_v0, %s1517_s6  ;;  %42 = vrot.lane.b32.xlu0 %v40_v0, %s1518_s7  ;;  %s1519_s8 = smov 96   ;;  %s1520_s9 = smov 112   ;;  %v1531_v2 = vmov 1983009808   ;;  %v1532_v12 = vmov 1934713408  }
  0x28   :  { %s1521_s10 = smov 80   ;;  %s1522_s1 = smov 88   ;;  %v90_v3 = vunpack.c.l.s4 %v1531_v2  ;;  %v93_v7 = vshrl.u32 %v92_v4, 7  ;;  %v154_v13 = vunpack.c.l.s4 %v1532_v12  ;;  %v38_v12 = vld [vmem:[#allocation2] sm:$0xff]  ;;  %vm1333_vm1 = vcmask 64512  }
  0x29   :  { %s1523_s11 = smov 64   ;;  %s1524_s12 = smov 72   ;;  %vm1336_vm2 = vcmask 195584   ;;  %vm1338_vm3 = vcmask 261120   ;;  %vm1340_vm4 = vcmask 326656   ;;  %vm1342_vm5 = vcmask 392192  }
  0x2a   :  { %s1525_s13 = smov 48   ;;  %s1526_s14 = smov 56   ;;  %v91_v6 = vunpack.c.0.s8 %v90_v3  ;;  %v155_v21 = vunpack.c.0.s8 %v154_v13  ;;  %v39_v13 = vld [vmem:[#allocation2 + $0x8] sm:$0xff]  ;;  %vm1344_vm6 = vcmask 457728   ;;  %vm1346_vm7 = vcmask 523264  }
  0x2b   :  { %51 = vrot.lane.b32.xlu1 %v40_v0, %s1519_s8  ;;  %45 = vrot.lane.b32.xlu0 %v40_v0, %s1520_s9  ;;  %s1527_s15 = smov 32   ;;  %s1528_s16 = smov 40   ;;  %vm1348_vm8 = vcmask 588800   ;;  %vm1350_vm9 = vcmask 654336   ;;  %vm1352_vm10 = vcmask 719872   ;;  %vm1354_vm11 = vcmask 785408  }
  0x2c   :  { %s1529_s17 = smov 16   ;;  %s1530_s18 = smov 24   ;;  %v1589_v14 = vsub.s32 %v91_v6, %v93_v7  ;;  %v1603_v30 = vsub.s32 %v155_v21, %v93_v7  ;;  %vm1356_vm12 = vcmask 850944   ;;  %vm1358_vm13 = vcmask 916480  }
  0x2d   :  { %s1533_s19 = smov [#allocation7]   ;;  %vm1360_vm14 = vcmask 982016  }
  0x2f   :  { %57 = vrot.lane.b32.xlu1 %v40_v0, %s1521_s10  ;;  %54 = vrot.lane.b32.xlu0 %v40_v0, %s1522_s1 }
  0x33   :  { %63 = vrot.lane.b32.xlu1 %v40_v0, %s1523_s11  ;;  %60 = vrot.lane.b32.xlu0 %v40_v0, %s1524_s12 }
  0x37   :  { %69 = vrot.lane.b32.xlu1 %v40_v0, %s1525_s13  ;;  %66 = vrot.lane.b32.xlu0 %v40_v0, %s1526_s14 }
  0x3b   :  { %75 = vrot.lane.b32.xlu1 %v40_v0, %s1527_s15  ;;  %72 = vrot.lane.b32.xlu0 %v40_v0, %s1528_s16 }
  0x3f   :  { %81 = vrot.lane.b32.xlu1 %v40_v0, %s1529_s17  ;;  %78 = vrot.lane.b32.xlu0 %v40_v0, %s1530_s18 }
  0x43   :  { %84 = vrot.lane.b32.xlu0 %v40_v0, %s1515_s20 }
  0x99   :  { %v49_v1 = vpop.permute.xlu1 %48  ;;  %v43_v5 = vpop.permute.xlu0 %42 }
  0x9a   :  { %v103_v15 = vcombine.low %v43_v5, %v49_v1  ;;  %v104_v16 = vcombine.high %v43_v5, %v49_v1 }
  0x9c   :  { %v1598_v24 = vrot.slane %v103_v15, %v1589_v14  ;;  %v1601_v25 = vrot.slane %v104_v16, %v1589_v14  ;;  %v1413_v15 = vpack.c.bf16 %v39_v13, %v38_v12 }
  0x9d   :  { %v52_v8 = vpop.permute.xlu1 %51  ;;  %v46_v9 = vpop.permute.xlu0 %45 }
  0x9e   :  { %v87_v10 = vcombine.low %v40_v0, %v46_v9  ;;  %v88_v11 = vcombine.high %v40_v0, %v46_v9  ;;  %1414 = vmatprep.subr.bf16.mxu0 %v1413_v15  ;;  %1417 = vmatprep.subr.bf16.mxu1 %v1413_v15 }
  0x9f   :  { %1416 = vmatpush3.bf16.msra.mxu0 %v1413_v15  ;;  %1418 = vmatpush3.bf16.msra.mxu1 %v1413_v15 }
  0xa0   :  { %v1592_v19 = vrot.slane %v87_v10, %v1589_v14  ;;  %v1595_v20 = vrot.slane %v88_v11, %v1589_v14 }
  0xa1   :  { %v58_v17 = vpop.permute.xlu1 %57  ;;  %v55_v18 = vpop.permute.xlu0 %54 }
  0xa2   :  { %v119_v22 = vcombine.low %v52_v8, %v58_v17  ;;  %v120_v23 = vcombine.high %v52_v8, %v58_v17  ;;  %v167_v31 = vcombine.low %v1595_v20, %v1601_v25  ;;  %v151_v32 = vcombine.low %v1592_v19, %v1598_v24 }
  0xa4   :  { %v1610_v33 = vrot.slane %v119_v22, %v1589_v14  ;;  %v1613_v34 = vrot.slane %v120_v23, %v1589_v14  ;;  %v175_v41 = vrot.slane %v167_v31, %v1603_v30  ;;  %v159_v43 = vrot.slane %v151_v32, %v1603_v30 }
  0xa5   :  { %v64_v26 = vpop.permute.xlu1 %63  ;;  %v61_v27 = vpop.permute.xlu0 %60 }
  0xa6   :  { %v135_v28 = vcombine.low %v55_v18, %v61_v27  ;;  %v136_v29 = vcombine.high %v55_v18, %v61_v27  ;;  %v168_v27 = vcombine.high %v1595_v20, %v1601_v25 }
  0xa8   :  { %v1616_v35 = vrot.slane %v135_v28, %v1589_v14  ;;  %v1619_v36 = vrot.slane %v136_v29, %v1589_v14 }
  0xa9   :  { %v70_v37 = vpop.permute.xlu1 %69  ;;  %v67_v38 = vpop.permute.xlu0 %66 }
  0xaa   :  { %v199_v39 = vcombine.low %v1613_v34, %v1619_v36  ;;  %v183_v40 = vcombine.low %v1610_v33, %v1616_v35  ;;  %v223_v51 = vcombine.low %v64_v26, %v70_v37  ;;  %v224_v52 = vcombine.high %v64_v26, %v70_v37 }
  0xab   :  { %v184_v18 = vcombine.high %v1610_v33, %v1616_v35  ;;  %v200_v21 = vcombine.high %v1613_v34, %v1619_v36  ;;  %v152_v26 = vcombine.high %v1592_v19, %v1598_v24  ;;  %v182_v19 = vrot.slane %v168_v27, %v1603_v30 }
  0xac   :  { %v207_v42 = vrot.slane %v199_v39, %v1603_v30  ;;  %v191_v44 = vrot.slane %v183_v40, %v1603_v30  ;;  %v231_v59 = vrot.slane %v223_v51, %v1589_v14  ;;  %v238_v60 = vrot.slane %v224_v52, %v1589_v14 }
  0xad   :  { %v76_v45 = vpop.permute.xlu1 %75  ;;  %v73_v46 = vpop.permute.xlu0 %72  ;;  %v198_v28 = vrot.slane %v184_v18, %v1603_v30  ;;  %v214_v29 = vrot.slane %v200_v21, %v1603_v30  ;;  %v166_v35 = vrot.slane %v152_v26, %v1603_v30 }
  0xae   :  { %v219_v47 = vcombine.low %v175_v41, %v207_v42  ;;  %v215_v48 = vcombine.low %v159_v43, %v191_v44  ;;  %v239_v49 = vcombine.low %v67_v38, %v73_v46  ;;  %v240_v50 = vcombine.high %v67_v38, %v73_v46 }
  0xaf   :  { %v216_v22 = vcombine.high %v159_v43, %v191_v44  ;;  %v220_v23 = vcombine.high %v175_v41, %v207_v42  ;;  %v217_v24 = vcombine.low %v166_v35, %v198_v28  ;;  %v221_v38 = vcombine.low %v182_v19, %v214_v29 }
  0xb0   :  { %487 = vxpose.xlu0.b32.start [1/2] (short) (narrow) %v219_v47, 8  ;;  %359 = vxpose.xlu1.b32.start [1/2] (short) (narrow) %v215_v48, 8  ;;  %v247_v55 = vrot.slane %v239_v49, %v1589_v14  ;;  %v254_v56 = vrot.slane %v240_v50, %v1589_v14  ;;  %v218_v43 = vcombine.high %v166_v35, %v198_v28 }
  0xb1   :  { %v82_v53 = vpop.permute.xlu1 %81  ;;  %v79_v54 = vpop.permute.xlu0 %78  ;;  %v222_v44 = vcombine.high %v182_v19, %v214_v29 }
  0xb2   :  { %v255_v57 = vcombine.low %v76_v45, %v82_v53  ;;  %v256_v58 = vcombine.high %v76_v45, %v82_v53  ;;  %v287_v0 = vcombine.low %v231_v59, %v247_v55  ;;  %v303_v1 = vcombine.low %v238_v60, %v254_v56 }
  0xb3   :  { %v288_v36 = vcombine.high %v231_v59, %v247_v55  ;;  %v304_v37 = vcombine.high %v238_v60, %v254_v56 }
  0xb4   :  { %v263_v2 = vrot.slane %v255_v57, %v1589_v14  ;;  %v270_v3 = vrot.slane %v256_v58, %v1589_v14  ;;  %v311_v8 = vrot.slane %v303_v1, %v1603_v30  ;;  %v295_v10 = vrot.slane %v287_v0, %v1603_v30 }
  0xb5   :  { %v85_v61 = vpop.permute.xlu0 %84  ;;  %v302_v39 = vrot.slane %v288_v36, %v1603_v30  ;;  %v318_v40 = vrot.slane %v304_v37, %v1603_v30 }
  0xb6   :  { %v271_v62 = vcombine.low %v79_v54, %v85_v61  ;;  %v272_v63 = vcombine.high %v79_v54, %v85_v61 }
  0xb8   :  { %v279_v4 = vrot.slane %v271_v62, %v1589_v14  ;;  %v286_v5 = vrot.slane %v272_v63, %v1589_v14 }
  0xba   :  { %v319_v6 = vcombine.low %v263_v2, %v279_v4  ;;  %v335_v7 = vcombine.low %v270_v3, %v286_v5  ;;  %v320_v31 = vcombine.high %v263_v2, %v279_v4  ;;  %v336_v32 = vcombine.high %v270_v3, %v286_v5 }
  0xbc   :  { %v343_v9 = vrot.slane %v335_v7, %v1603_v30  ;;  %v327_v11 = vrot.slane %v319_v6, %v1603_v30  ;;  %v334_v20 = vrot.slane %v320_v31, %v1603_v30  ;;  %v350_v25 = vrot.slane %v336_v32, %v1603_v30 }
  0xbe   :  { %v355_v16 = vcombine.low %v311_v8, %v343_v9  ;;  %v351_v17 = vcombine.low %v295_v10, %v327_v11  ;;  %v352_v33 = vcombine.high %v295_v10, %v327_v11  ;;  %v356_v34 = vcombine.high %v311_v8, %v343_v9 }
  0xbf   :  { %v353_v41 = vcombine.low %v302_v39, %v334_v20  ;;  %v357_v42 = vcombine.low %v318_v40, %v350_v25  ;;  %v354_v45 = vcombine.high %v302_v39, %v334_v20  ;;  %v358_v46 = vcombine.high %v318_v40, %v350_v25 }
  0xc0   :  { %488 = vxpose.xlu0.b32.end [2/2] (short) (narrow) %v355_v16, 8  ;;  %360 = vxpose.xlu1.b32.end [2/2] (short) (narrow) %v351_v17, 8 }
  0xc4   :  { %391 = vxpose.xlu0.b32.start [1/2] (short) (narrow) %v216_v22, 8  ;;  %519 = vxpose.xlu1.b32.start [1/2] (short) (narrow) %v220_v23, 8 }
  0xc8   :  { %392 = vxpose.xlu0.b32.end [2/2] (short) (narrow) %v352_v33, 8  ;;  %520 = vxpose.xlu1.b32.end [2/2] (short) (narrow) %v356_v34, 8 }
  0xcc   :  { %423 = vxpose.xlu0.b32.start [1/2] (short) (narrow) %v217_v24, 8  ;;  %551 = vxpose.xlu1.b32.start [1/2] (short) (narrow) %v221_v38, 8 }
  0xd0   :  { %424 = vxpose.xlu0.b32.end [2/2] (short) (narrow) %v353_v41, 8  ;;  %552 = vxpose.xlu1.b32.end [2/2] (short) (narrow) %v357_v42, 8 }
  0xd4   :  { %455 = vxpose.xlu0.b32.start [1/2] (short) (narrow) %v218_v43, 8  ;;  %583 = vxpose.xlu1.b32.start [1/2] (short) (narrow) %v222_v44, 8 }
  0xd8   :  { %456 = vxpose.xlu0.b32.end [2/2] (short) (narrow) %v354_v45, 8  ;;  %584 = vxpose.xlu1.b32.end [2/2] (short) (narrow) %v358_v46, 8 }
 0x13c   :  { %v503_v47 = vpop.trf.xlu0  ;;  %v375_v48 = vpop.trf.xlu1 }
 0x13d   :  { %1407 = vmatprep.mubr.msk.f32.mxu1 %vm615_vm0, %v503_v47  ;;  %1401 = vmatprep.mubr.msk.f32.mxu0 %vm615_vm0, %v375_v48 }
 0x144   :  { %v407_v49 = vpop.trf.xlu0  ;;  %v535_v50 = vpop.trf.xlu1 }
 0x145   :  { %1402 = vmatmul.mubr.msk.f32.vlgmr.msra.gmra.mrb[0].mxu0 %vm615_vm0, %v407_v49  ;;  %1408 = vmatmul.mubr.msk.f32.vlgmr.msra.gmra.mrb[0].mxu1 %vm615_vm0, %v535_v50 }
 0x14c   :  { %v439_v51 = vpop.trf.xlu0  ;;  %v567_v52 = vpop.trf.xlu1 }
 0x14d   :  { %1404 = vmatprep.mubr.msk.f32.mxu0 %vm615_vm0, %v439_v51  ;;  %1410 = vmatprep.mubr.msk.f32.mxu1 %vm615_vm0, %v567_v52 }
 0x154   :  { %v471_v53 = vpop.trf.xlu0  ;;  %v599_v54 = vpop.trf.xlu1 }
 0x155   :  { %1405 = vmatmul.mubr.msk.f32.gmra.mrb[2].mxu0 %vm615_vm0, %v471_v53  ;;  %1411 = vmatmul.mubr.msk.f32.gmra.mrb[2].mxu1 %vm615_vm0, %v599_v54 }
 0x218   :  { %v1403_v55 = vpop.f32.mrb[0].mxu0  ;;  %v1409_v56 = vpop.f32.mrb[0].mxu1 }
 0x219   :  { %777 = vxpose.xlu0.b32.start.end [1/1] (short) (narrow) %v1403_v55, 16  ;;  %v706_v57 = vpop.f32.mrb[1].mxu0  ;;  %v726_v58 = vpop.f32.mrb[1].mxu1 }
 0x21a   :  { %873 = vxpose.xlu1.b32.start.end [1/1] (short) (narrow) %v726_v58, 16 }
 0x21e   :  { %905 = vxpose.xlu0.b32.start.end [1/1] (short) (narrow) %v1409_v56, 16 }
 0x223   :  { %745 = vxpose.xlu0.b32.start.end [1/1] (short) (narrow) %v706_v57, 16 }
 0x228   :  { %v1406_v59 = vpop.f32.mrb[2].mxu0  ;;  %v1412_v60 = vpop.f32.mrb[2].mxu1 }
 0x229   :  { %v716_v61 = vpop.f32.mrb[3].mxu0  ;;  %841 = vxpose.xlu0.b32.start.end [1/1] (short) (narrow) %v1406_v59, 16  ;;  %v736_v62 = vpop.f32.mrb[3].mxu1 }
 0x22a   :  { %809 = vxpose.xlu1.b32.start.end [1/1] (short) (narrow) %v716_v61, 16 }
 0x22e   :  { %969 = vxpose.xlu0.b32.start.end [1/1] (short) (narrow) %v1412_v60, 16 }
 0x22f   :  { %937 = vxpose.xlu1.b32.start.end [1/1] (short) (narrow) %v736_v62, 16 }
 0x299   :  { %v793_v63 = vpop.trf.xlu0 }
 0x29a   :  { %v889_v1 = vpop.trf.xlu1 }
 0x29d   :  { %v1665_v0 = vpop.trf.xlu0 }
 0x29e   :  { %v1667_v3 = vpop.trf.xlu1 }
 0x2a1   :  { %v921_v2 = vpop.trf.xlu0 }
 0x2a5   :  { %v922_v4 = vpop.trf.xlu0 }
 0x2a9   :  { %v761_v5 = vpop.trf.xlu0 }
 0x2aa   :  { %v825_v6 = vpop.trf.xlu1 }
 0x2ab   :  { %v1001_v13 = vcombine.low %v761_v5, %v825_v6  ;;  %v1002_v21 = vcombine.high %v761_v5, %v825_v6 }
 0x2ad   :  { %v1669_v7 = vpop.trf.xlu0  ;;  %v1009_v26 = vrot.slane %v1001_v13, %v1589_v14  ;;  %v1016_v19 = vrot.slane %v1002_v21, %v1589_v14 }
 0x2ae   :  { %v1671_v8 = vpop.trf.xlu1 }
 0x2af   :  { %v1137_v24 = vcombine.low %v1669_v7, %v1671_v8  ;;  %v1138_v62 = vcombine.high %v1669_v7, %v1671_v8 }
 0x2b1   :  { %v857_v9 = vpop.trf.xlu0  ;;  %v1145_v48 = vrot.slane %v1137_v24, %v1589_v14 }
 0x2b2   :  { %v953_v10 = vpop.trf.xlu1  ;;  %v1017_v11 = vcombine.low %v793_v63, %v857_v9  ;;  %v1018_v15 = vcombine.high %v793_v63, %v857_v9 }
 0x2b3   :  { %v1033_v16 = vcombine.low %v889_v1, %v953_v10  ;;  %v1034_v17 = vcombine.high %v889_v1, %v953_v10 }
 0x2b4   :  { %v1025_v18 = vrot.slane %v1017_v11, %v1589_v14  ;;  %v1032_v29 = vrot.slane %v1018_v15, %v1589_v14  ;;  %v1152_v11 = vrot.slane %v1138_v62, %v1589_v14 }
 0x2b5   :  { %v858_v12 = vpop.trf.xlu0  ;;  %v1041_v31 = vrot.slane %v1033_v16, %v1589_v14  ;;  %v1048_v32 = vrot.slane %v1034_v17, %v1589_v14 }
 0x2b6   :  { %v954_v22 = vpop.trf.xlu1  ;;  %v1153_v33 = vcombine.low %v1665_v0, %v858_v12  ;;  %v1066_v34 = vcombine.high %v1009_v26, %v1025_v18  ;;  %v1065_v20 = vcombine.low %v1009_v26, %v1025_v18  ;;  %v1082_v41 = vcombine.high %v1016_v19, %v1032_v29 }
 0x2b7   :  { %v1169_v35 = vcombine.low %v1667_v3, %v954_v22  ;;  %v1154_v58 = vcombine.high %v1665_v0, %v858_v12  ;;  %v1170_v60 = vcombine.high %v1667_v3, %v954_v22  ;;  %v1081_v63 = vcombine.low %v1016_v19, %v1032_v29 }
 0x2b8   :  { %v1161_v42 = vrot.slane %v1153_v33, %v1589_v14  ;;  %v1080_v46 = vrot.slane %v1066_v34, %v1603_v30  ;;  %v1692_v49 = vrot.slane %v1065_v20, %v1603_v30  ;;  %v1096_v61 = vrot.slane %v1082_v41, %v1603_v30 }
 0x2b9   :  { %v985_v23 = vpop.trf.xlu0  ;;  %v1177_v44 = vrot.slane %v1169_v35, %v1589_v14  ;;  %v1168_v3 = vrot.slane %v1154_v58, %v1589_v14  ;;  %v1184_v10 = vrot.slane %v1170_v60, %v1589_v14  ;;  %v1089_v8 = vrot.slane %v1081_v63, %v1603_v30 }
 0x2ba   :  { %v1049_v27 = vcombine.low %v921_v2, %v985_v23  ;;  %v1050_v28 = vcombine.high %v921_v2, %v985_v23  ;;  %v1201_v59 = vcombine.low %v1145_v48, %v1161_v42  ;;  %v1202_v9 = vcombine.high %v1145_v48, %v1161_v42 }
 0x2bb   :  { %v1217_v17 = vcombine.low %v1152_v11, %v1168_v3 }
 0x2bc   :  { %v1057_v36 = vrot.slane %v1049_v27, %v1589_v14  ;;  %v1064_v37 = vrot.slane %v1050_v28, %v1589_v14  ;;  %v1209_v7 = vrot.slane %v1201_v59, %v1603_v30  ;;  %v1216_v18 = vrot.slane %v1202_v9, %v1603_v30 }
 0x2bd   :  { %v986_v38 = vpop.trf.xlu0  ;;  %v1218_v27 = vcombine.high %v1152_v11, %v1168_v3 }
 0x2be   :  { %v1098_v25 = vcombine.high %v1041_v31, %v1057_v36  ;;  %v1114_v39 = vcombine.high %v1048_v32, %v1064_v37  ;;  %v1185_v40 = vcombine.low %v922_v4, %v986_v38  ;;  %v1097_v43 = vcombine.low %v1041_v31, %v1057_v36 }
 0x2bf   :  { %v1186_v51 = vcombine.high %v922_v4, %v986_v38  ;;  %v1113_v55 = vcombine.low %v1048_v32, %v1064_v37  ;;  %v1232_v32 = vrot.slane %v1218_v27, %v1603_v30 }
 0x2c0   :  { %v1193_v45 = vrot.slane %v1185_v40, %v1589_v14  ;;  %v1112_v47 = vrot.slane %v1098_v25, %v1603_v30  ;;  %v1695_v50 = vrot.slane %v1097_v43, %v1603_v30  ;;  %v1128_v54 = vrot.slane %v1114_v39, %v1603_v30 }
 0x2c1   :  { %v1200_v1 = vrot.slane %v1186_v51, %v1589_v14  ;;  %v1121_v6 = vrot.slane %v1113_v55, %v1603_v30  ;;  %v1225_v14 = vrot.slane %v1217_v17, %v1603_v30 }
 0x2c2   :  { %v1233_v52 = vcombine.low %v1177_v44, %v1193_v45  ;;  %v1131_v53 = vcombine.low %v1080_v46, %v1112_v47  ;;  %v1130_v56 = vcombine.high %v1692_v49, %v1695_v50  ;;  %v1129_v57 = vcombine.low %v1692_v49, %v1695_v50 }
 0x2c3   :  { %v1234_v2 = vcombine.high %v1177_v44, %v1193_v45  ;;  %v1136_v4 = vcombine.high %v1096_v61, %v1128_v54  ;;  %v1132_v0 = vcombine.high %v1080_v46, %v1112_v47  ;;  %v1249_v12 = vcombine.low %v1184_v10, %v1200_v1 }
 0x2c4   :  { %1278 = vrot.lane.b32.xlu0 %v1131_v53, %s1529_s17  ;;  %1274 = vrot.lane.b32.xlu1 %v1130_v56, %s1515_s20  ;;  %v1241_v5 = vrot.slane %v1233_v52, %v1603_v30  ;;  %v1133_v16 = vcombine.low %v1089_v8, %v1121_v6  ;;  %v1250_v21 = vcombine.high %v1184_v10, %v1200_v1  ;;  %s1369_s20 = sshll.u32 %s1533_s19, 4  ;;  %s1370_s20 = int_to_ptr.vmem [resolvable:$true] %s1369_s20 }
 0x2c5   :  { %v1248_v15 = vrot.slane %v1234_v2, %v1603_v30  ;;  %v1257_v23 = vrot.slane %v1249_v12, %v1603_v30  ;;  %v1134_v26 = vcombine.high %v1089_v8, %v1121_v6  ;;  %v1135_v31 = vcombine.low %v1096_v61, %v1128_v54  ;;  %s1485_s21 = scalar_lea.vmem %s1370_s20, 128  ;;  %p1490_p3 = scmp.lt.s32.totalorder %s1370_s20, %s1370_s20 }
 0x2c6   :  { %v1266_v13 = vcombine.high %v1209_v7, %v1241_v5  ;;  %v1264_v29 = vrot.slane %v1250_v21, %v1603_v30  ;;  %v1265_v34 = vcombine.low %v1209_v7, %v1241_v5  ;;  %p1486_p2 = scmp.ne.s32.totalorder %s1370_s20, %s1485_s21  ;;  %p1491_p4 = scmp.lt.s32.totalorder %s1485_s21, %s1485_s21 }
 0x2c7   :  { %v1268_v22 = vcombine.high %v1216_v18, %v1248_v15  ;;  %v1270_v28 = vcombine.high %v1225_v14, %v1257_v23  ;;  %v1267_v35 = vcombine.low %v1216_v18, %v1248_v15  ;;  %v1269_v36 = vcombine.low %v1225_v14, %v1257_v23 }
 0x2c8   :  { %1298 = vrot.lane.b32.xlu0 %v1136_v4, %s1526_s14  ;;  %1282 = vrot.lane.b32.xlu1 %v1132_v0, %s1530_s18  ;;  %v1272_v33 = vcombine.high %v1232_v32, %v1264_v29  ;;  %v1271_v37 = vcombine.low %v1232_v32, %v1264_v29  ;;  %p1492_p5 = por %p1491_p4, %p1490_p3 }
 0x2ca   :  { %p1493_p6 = pnand %p1492_p5, %p1486_p2 }
 0x2cc   :  { %1306 = vrot.lane.b32.xlu0 %v1266_v13, %s1524_s12  ;;  %1286 = vrot.lane.b32.xlu1 %v1133_v16, %s1527_s15 }
 0x2d0   :  { %1314 = vrot.lane.b32.xlu0 %v1268_v22, %s1522_s1  ;;  %1290 = vrot.lane.b32.xlu1 %v1134_v26, %s1528_s16 }
 0x2d4   :  { %1322 = vrot.lane.b32.xlu0 %v1270_v28, %s1517_s6  ;;  %1294 = vrot.lane.b32.xlu1 %v1135_v31, %s1525_s13 }
 0x2d8   :  { %1330 = vrot.lane.b32.xlu0 %v1272_v33, %s1518_s7  ;;  %1302 = vrot.lane.b32.xlu1 %v1265_v34, %s1523_s11 }
 0x2dc   :  { %1310 = vrot.lane.b32.xlu1 %v1267_v35, %s1521_s10 }
 0x2e0   :  { %1318 = vrot.lane.b32.xlu1 %v1269_v36, %s1519_s8 }
 0x2e4   :  { %1326 = vrot.lane.b32.xlu1 %v1271_v37, %s1520_s9 }
 0x336   :  { %v1275_v19 = vpop.permute.xlu1 %1274  ;;  %v1279_v24 = vpop.permute.xlu0 %1278 }
 0x337   :  { %v1334_v25 = vsel %vm1333_vm1, %v1129_v57, %v1275_v19 }
 0x338   :  { %v1335_v40 = vsel %vm615_vm0, %v1334_v25, %v1279_v24 }
 0x33a   :  { %v1283_v30 = vpop.permute.xlu1 %1282  ;;  %v1299_v20 = vpop.permute.xlu0 %1298 }
 0x33b   :  { %v1337_v41 = vsel %vm1336_vm2, %v1335_v40, %v1283_v30 }
 0x33e   :  { %v1287_v38 = vpop.permute.xlu1 %1286  ;;  %v1307_v42 = vpop.permute.xlu0 %1306 }
 0x33f   :  { %v1339_v43 = vsel %vm1338_vm3, %v1337_v41, %v1287_v38 }
 0x342   :  { %v1291_v39 = vpop.permute.xlu1 %1290  ;;  %v1315_v49 = vpop.permute.xlu0 %1314 }
 0x343   :  { %v1341_v44 = vsel %vm1340_vm4, %v1339_v43, %v1291_v39 }
 0x346   :  { %v1295_v45 = vpop.permute.xlu1 %1294  ;;  %v1323_v54 = vpop.permute.xlu0 %1322 }
 0x347   :  { %v1343_v46 = vsel %vm1342_vm5, %v1341_v44, %v1295_v45 }
 0x348   :  { %v1345_v47 = vsel %vm1344_vm6, %v1343_v46, %v1299_v20 }
 0x34a   :  { %v1303_v48 = vpop.permute.xlu1 %1302  ;;  %v1331_v60 = vpop.permute.xlu0 %1330 }
 0x34b   :  { %v1347_v50 = vsel %vm1346_vm7, %v1345_v47, %v1303_v48 }
 0x34c   :  { %v1349_v51 = vsel %vm1348_vm8, %v1347_v50, %v1307_v42 }
 0x34e   :  { %v1311_v52 = vpop.permute.xlu1 %1310 }
 0x34f   :  { %v1351_v53 = vsel %vm1350_vm9, %v1349_v51, %v1311_v52 }
 0x350   :  { %v1353_v55 = vsel %vm1352_vm10, %v1351_v53, %v1315_v49 }
 0x352   :  { %v1319_v56 = vpop.permute.xlu1 %1318 }
 0x353   :  { %v1355_v57 = vsel %vm1354_vm11, %v1353_v55, %v1319_v56 }
 0x354   :  { %v1357_v58 = vsel %vm1356_vm12, %v1355_v57, %v1323_v54 }
 0x356   :  { %v1327_v59 = vpop.permute.xlu1 %1326 }
 0x357   :  { %v1359_v61 = vsel %vm1358_vm13, %v1357_v58, %v1327_v59 }
 0x358   :  { %v1361_v62 = vsel %vm1360_vm14, %v1359_v61, %v1331_v60 }
 0x359   :  { %1362 = vst [vmem:[#allocation7] sm:$0xff] %v1361_v62 }
 0x35a   :  { %1496 = shalt.err (!%p1493_p6)
}
 0x35b   :  { %s1497_s24 = scalar_lea.hbm %s1751_s2, 128 }
 0x35c   :  { %p1498_p7 = scmp.ne.s32.totalorder %s1751_s2, %s1497_s24  ;;  %p1501_p8 = scmp.lt.u32.totalorder %s1497_s24, %s1751_s2 }
 0x35e   :  { %p1503_p9 = pnand %p1501_p8, %p1498_p7 }
 0x360   :  { %1506 = shalt.err (!%p1503_p9)
}
 0x361   :  { %1372 = dma.vmem_to_hbm [thread:$0]  %s1370_s20, 128, %s1751_s2, [#allocation4]  }
 0x362   :  { %1511 = dma.done.wait [#allocation4], 128  }
 0x363   :  { %1512 = vsyncadd [#allocation4], 4294967168 }
 0x364   :  { %1376 = vsyncpa [#allocation3], 1 }
 0x365   :  { %1377 = vsyncpa [#allocation6], 1 }
 0x366   :  { %1378 = vsyncpa [#allocation4], 1 }

</bundles_post_ra>
